<compile_context>
chip_gen: v5e
topology: v5e:2x2
jax: 0.10.0
libtpu: 0.0.40
codegen_flags: <defaults>
</compile_context>

<pallas_src>
import functools

import jax
import jax.numpy as jnp
from jax.experimental import pallas as pl
from jax.experimental.pallas import tpu as pltpu


def _vmem_capacity_bytes():
    """Physical VMEM per core; conservative fallback if the query fails."""
    try:
        info = pltpu.get_tpu_info()
        cap = int(getattr(info, "vmem_capacity_bytes", 0))
        if cap > 0:
            return cap
    except Exception:
        pass
    return 64 << 20  # v7x-sized fallback; safe on every generation.


def _tensorcores_per_device():
    """2 on megacore-style chips (v4 / v5p / v7x), else 1."""
    try:
        kind = jax.devices()[0].device_kind.lower()
    except Exception:
        return 2  # correctness-safe either way
    if any(tok in kind for tok in ("v4", "v5p", "v7", "7x")):
        return 2
    return 1


def _stft_loss_partials_kernel(x_ref, y_ref, od_ref, oy_ref, *,
                               n_rows, row_tile, sub_rows, need_mask):
    """Accumulate per-partition partial sums of (y - x)^2 and y^2."""
    p = pl.program_id(0)          # partition ("parallel") axis
    i = pl.program_id(1)          # sequential reduction axis
    steps = pl.num_programs(1)

    # Outputs are resident across the reduction axis -> they ARE the
    # accumulators. Zero them at the start of each partition's sweep.
    @pl.when(i == 0)
    def _init():
        od_ref[...] = jnp.zeros_like(od_ref)
        oy_ref[...] = jnp.zeros_like(oy_ref)

    row_start = (p * steps + i) * row_tile      # UNclamped linear row index

    def chunk(start, size, acc_d, acc_y, masked):
        # Sub-chunk sized loads keep intermediates at ~vreg scale.
        x = x_ref[pl.ds(start, size), :].astype(jnp.float32)
        y = y_ref[pl.ds(start, size), :].astype(jnp.float32)
        d = y - x
        d2 = d * d
        y2 = y * y
        if masked:
            # Rows at/after n_rows are out-of-bounds block padding (or a clamped
            # duplicate of the last block in a spare grid slot) -> zero them.
            # (rows, 1) iota; the select broadcasts across lanes.
            rows = (row_start + start
                    + jax.lax.broadcasted_iota(jnp.int32, (size, 1), 0))
            valid = rows < n_rows
            d2 = jnp.where(valid, d2, 0.0)
            y2 = jnp.where(valid, y2, 0.0)
        # Fold (size, F) onto the (1, 8, F) partial with pure VPU adds; the
        # reshape only regroups sublane rows (no relayout).
        g = size // 8
        acc_d = acc_d + d2.reshape(1, g, 8, -1).sum(axis=1)
        acc_y = acc_y + y2.reshape(1, g, 8, -1).sum(axis=1)
        return acc_d, acc_y

    def accumulate(masked):
        # Carry the (1, 8, F) partials in vregs across the sub-chunk loop and
        # touch the VMEM accumulator only once per grid step.
        acc_d = jnp.zeros(od_ref.shape, jnp.float32)
        acc_y = jnp.zeros(oy_ref.shape, jnp.float32)
        n_full = row_tile // sub_rows
        tail = row_tile - n_full * sub_rows
        if n_full > 0:
            def body(g, carry):
                start = pl.multiple_of(g * sub_rows, sub_rows)
                return chunk(start, sub_rows, carry[0], carry[1], masked)
            acc_d, acc_y = jax.lax.fori_loop(0, n_full, body, (acc_d, acc_y))
        if tail > 0:                               # static remainder chunk
            acc_d, acc_y = chunk(n_full * sub_rows, tail, acc_d, acc_y, masked)
        od_ref[...] += acc_d
        oy_ref[...] += acc_y

    if need_mask:
        # Only tail / clamped-spare blocks pay for the mask work.
        is_tail = row_start + row_tile > n_rows

        @pl.when(is_tail)
        def _masked():
            accumulate(True)

        @pl.when(jnp.logical_not(is_tail))
        def _clean():
            accumulate(False)
    else:
        accumulate(False)


def linear_scale_stft_loss(x_mag, y_mag, *, block_rows=None,
                           target_block_bytes=None, num_partitions=None):
    """Pallas equivalent of torch.norm(y - x, 'fro') / torch.norm(y, 'fro')."""
    assert x_mag.shape == y_mag.shape
    assert x_mag.dtype == y_mag.dtype
    B, T, F = x_mag.shape
    R = B * T

    x2 = x_mag.reshape(R, F)      # free reshape (contiguous), no HBM copy
    y2 = y_mag.reshape(R, F)

    itemsize = jnp.dtype(x_mag.dtype).itemsize
    sublane_mult = max(8, 32 // itemsize)          # 8 f32, 16 bf16, 32 int8/fp8
    f_vmem = pl.cdiv(F, 128) * 128                 # lane-padded width in VMEM
    f_vmem_bytes = f_vmem * itemsize

    # Tiny inputs: pad rows up to one sublane tile (a few KB); padded rows are
    # zeros so they contribute nothing to either sum.
    if R < sublane_mult:
        r_pad = sublane_mult
        x2 = jnp.pad(x2, ((0, r_pad - R), (0, 0)))
        y2 = jnp.pad(y2, ((0, r_pad - R), (0, 0)))
        R = r_pad
    n_rows = R

    # --- generation-aware block sizing & VMEM budget -------------------------
    cap = _vmem_capacity_bytes()
    # 2 inputs x 2 pipeline buffers must fit with headroom for accumulators,
    # sub-chunk temporaries and Mosaic overhead.
    max_block_bytes = max(1 << 20, (cap - (16 << 20)) // 4)
    if target_block_bytes is None:
        target_block_bytes = min(16 << 20, max_block_bytes)
    target_block_bytes = min(target_block_bytes, max_block_bytes)

    if block_rows is None:
        block_rows = target_block_bytes // f_vmem_bytes
    max_rows = max(sublane_mult,
                   (max_block_bytes // f_vmem_bytes) // sublane_mult * sublane_mult)
    row_tile = max(sublane_mult, (block_rows // sublane_mult) * sublane_mult)
    row_tile = min(row_tile, max_rows)
    # Keep every block start inside the array (last block may be partial).
    row_tile = min(row_tile, (R // sublane_mult) * sublane_mult)

    num_blocks = pl.cdiv(n_rows, row_tile)
    if num_partitions is None:
        num_partitions = _tensorcores_per_device()
    P = max(1, min(num_partitions, num_blocks))
    steps = pl.cdiv(num_blocks, P)
    need_mask = (P * steps * row_tile) != n_rows
    last_block = num_blocks - 1

    # Sub-chunk rows for the in-kernel loop (~16K f32 elements per chunk).
    sub_rows = max(sublane_mult,
                   (16384 // f_vmem) // sublane_mult * sublane_mult)
    sub_rows = min(sub_rows, row_tile)

    # Clamp the block index so every DMA window starts in-bounds; spare grid
    # slots re-read the last block and are fully masked out in the kernel.
    def in_map(p, i):
        return (jnp.minimum(p * steps + i, last_block), 0)

    def out_map(p, i):
        return (p, 0, 0)

    kernel = functools.partial(
        _stft_loss_partials_kernel,
        n_rows=n_rows, row_tile=row_tile, sub_rows=sub_rows,
        need_mask=need_mask)

    block_vmem = row_tile * f_vmem_bytes
    vmem_limit = int(max(32 << 20,
                         min(cap - (8 << 20), 4 * block_vmem + (16 << 20))))

    out_d, out_y = pl.pallas_call(
        kernel,
        out_shape=(
            jax.ShapeDtypeStruct((P, 8, F), jnp.float32),
            jax.ShapeDtypeStruct((P, 8, F), jnp.float32),
        ),
        grid_spec=pltpu.PrefetchScalarGridSpec(
            num_scalar_prefetch=0,
            grid=(P, steps),
            in_specs=[
                pl.BlockSpec((row_tile, F), in_map),
                pl.BlockSpec((row_tile, F), in_map),
            ],
            out_specs=[
                pl.BlockSpec((1, 8, F), out_map),
                pl.BlockSpec((1, 8, F), out_map),
            ],
        ),
        compiler_params=pltpu.CompilerParams(
            dimension_semantics=("parallel", "arbitrary"),
            vmem_limit_bytes=vmem_limit,
        ),
    )(x2, y2)

    num = jnp.sqrt(jnp.sum(out_d))
    den = jnp.sqrt(jnp.sum(out_y))
    return num / den


def _reference(x_mag, y_mag):
    x = x_mag.astype(jnp.float32)
    y = y_mag.astype(jnp.float32)
    return jnp.linalg.norm((y - x).ravel()) / jnp.linalg.norm(y.ravel())


if __name__ == "__main__":
    key = jax.random.PRNGKey(0)

    # (shape, dtype, block_rows, num_partitions) -- small shapes that exercise
    # every code path: defaults, masked tails, clamped spare slots, bf16.
    cases = [
        ((2, 13, 129), jnp.float32, None, None),  # default sizing, partial last block
        ((2, 13, 129), jnp.float32, 8, 2),        # P=2, steps=2, masked tail
        ((2, 11, 129), jnp.float32, 8, 2),        # clamped spare grid slot
        ((2, 500, 129), jnp.float32, 256, 2),     # fori_loop sub-chunks + masked tail
        ((2, 500, 129), jnp.float32, None, 1),    # single block, clean path + tail chunk
        ((3, 40, 257), jnp.bfloat16, 64, 1),      # bf16 streaming, f32 math
    ]

    for shape, dtype, br, npart in cases:
        key, kx, ky = jax.random.split(key, 3)
        x_mag = jnp.abs(jax.random.normal(kx, shape, dtype=jnp.float32)).astype(dtype)
        y_mag = jnp.abs(jax.random.normal(ky, shape, dtype=jnp.float32)).astype(dtype)

        loss = linear_scale_stft_loss(x_mag, y_mag, block_rows=br,
                                      num_partitions=npart)
        loss = jax.block_until_ready(loss)

        ref = _reference(x_mag, y_mag)
        assert jnp.allclose(loss, ref, rtol=1e-4, atol=1e-6), (
            shape, dtype, br, npart, loss, ref)

    print("KERNEL_OK")
</pallas_src>

<mosaic_0001>
module attributes {stable_mosaic.version = 11 : i64} {
  func.func @_stft_loss_partials_kernel(%arg0: i32, %arg1: i32, %arg2: memref<24x129xf32, #tpu.memory_space<vmem>>, %arg3: memref<24x129xf32, #tpu.memory_space<vmem>>, %arg4: memref<1x8x129xf32, #tpu.memory_space<vmem>>, %arg5: memref<1x8x129xf32, #tpu.memory_space<vmem>>) attributes {dimension_semantics = [#tpu.dimension_semantics<parallel>, #tpu.dimension_semantics<arbitrary>], iteration_bounds = array<i64: 1, 2>, scalar_prefetch = 0 : i64, scratch_operands = 0 : i64, tpu.core_type = #tpu.core_type<tc>, window_params = [{transform_indices = @transform_0, window_bounds = array<i64: 24, 129>}, {transform_indices = @transform_1, window_bounds = array<i64: 24, 129>}, {transform_indices = @transform_2, window_bounds = array<i64: 1, 8, 129>}, {transform_indices = @transform_3, window_bounds = array<i64: 1, 8, 129>}]} {
    %c0_i32 = arith.constant 0 : i32
    %0 = arith.cmpi eq, %arg1, %c0_i32 : i32
    %1 = arith.extui %0 : i1 to i32
    %c0_i32_0 = arith.constant 0 : i32
    %2 = arith.cmpi ne, %1, %c0_i32_0 : i32
    scf.if %2 {
      %cst = arith.constant 0.000000e+00 : f32
      %13 = vector.broadcast %cst : f32 to vector<1x8x129xf32>
      %c0 = arith.constant 0 : index
      %c0_4 = arith.constant 0 : index
      %c0_5 = arith.constant 0 : index
      %14 = vector.load %arg4[%c0, %c0_4, %c0_5] : memref<1x8x129xf32, #tpu.memory_space<vmem>>, vector<1x8x129xf32>
      tpu.vector_store %arg4[%c0, %c0_4, %c0_5], %13 {strides = array<i32>} : memref<1x8x129xf32, #tpu.memory_space<vmem>>, vector<1x8x129xf32>,
      %cst_6 = arith.constant 0.000000e+00 : f32
      %15 = vector.broadcast %cst_6 : f32 to vector<1x8x129xf32>
      %c0_7 = arith.constant 0 : index
      %c0_8 = arith.constant 0 : index
      %c0_9 = arith.constant 0 : index
      %16 = vector.load %arg5[%c0_7, %c0_8, %c0_9] : memref<1x8x129xf32, #tpu.memory_space<vmem>>, vector<1x8x129xf32>
      tpu.vector_store %arg5[%c0_7, %c0_8, %c0_9], %15 {strides = array<i32>} : memref<1x8x129xf32, #tpu.memory_space<vmem>>, vector<1x8x129xf32>,
    } else {
    }
    %c2_i32 = arith.constant 2 : i32
    %3 = arith.muli %arg0, %c2_i32 : i32
    %4 = arith.addi %3, %arg1 : i32
    %c24_i32 = arith.constant 24 : i32
    %5 = arith.muli %4, %c24_i32 : i32
    %c24_i32_1 = arith.constant 24 : i32
    %6 = arith.addi %5, %c24_i32_1 : i32
    %c26_i32 = arith.constant 26 : i32
    %7 = arith.cmpi sgt, %6, %c26_i32 : i32
    %8 = arith.extui %7 : i1 to i32
    %c0_i32_2 = arith.constant 0 : i32
    %9 = arith.cmpi ne, %8, %c0_i32_2 : i32
    scf.if %9 {
      %cst = arith.constant 0.000000e+00 : f32
      %13 = vector.broadcast %cst : f32 to vector<1x8x129xf32>
      %cst_4 = arith.constant 0.000000e+00 : f32
      %14 = vector.broadcast %cst_4 : f32 to vector<1x8x129xf32>
      %c0_i32_5 = arith.constant 0 : i32
      %c24_i32_6 = arith.constant 24 : i32
      %15 = arith.muli %c0_i32_5, %c24_i32_6 : i32
      %16 = tpu.assume_multiple %15, 24 : i32
      %17 = arith.index_cast %16 : i32 to index
      %c0 = arith.constant 0 : index
      %18 = vector.load %arg2[%17, %c0] : memref<24x129xf32, #tpu.memory_space<vmem>>, vector<24x129xf32>
      %19 = arith.index_cast %16 : i32 to index
      %c0_7 = arith.constant 0 : index
      %20 = vector.load %arg3[%19, %c0_7] : memref<24x129xf32, #tpu.memory_space<vmem>>, vector<24x129xf32>
      %21 = arith.subf %20, %18 : vector<24x129xf32>
      %22 = arith.mulf %21, %21 : vector<24x129xf32>
      %23 = arith.mulf %20, %20 : vector<24x129xf32>
      %24 = arith.addi %5, %16 : i32
      %25 = tpu.iota {dimensions = array<i32: 0>} : vector<24x1xi32>
      %26 = vector.broadcast %24 : i32 to vector<24x1xi32>
      %27 = arith.addi %26, %25 : vector<24x1xi32>
      %c26_i32_8 = arith.constant 26 : i32
      %28 = vector.broadcast %c26_i32_8 : i32 to vector<24x1xi32>
      %29 = arith.cmpi slt, %27, %28 : vector<24x1xi32>
      %cst_9 = arith.constant 0.000000e+00 : f32
      %30 = vector.shape_cast %29 : vector<24x1xi1> to vector<24x1xi1>
      %31 = vector.broadcast %30 : vector<24x1xi1> to vector<24x129xi1>
      %32 = vector.broadcast %cst_9 : f32 to vector<24x129xf32>
      %33 = arith.select %31, %22, %32 : vector<24x129xi1>, vector<24x129xf32>
      %cst_10 = arith.constant 0.000000e+00 : f32
      %34 = vector.shape_cast %29 : vector<24x1xi1> to vector<24x1xi1>
      %35 = vector.broadcast %34 : vector<24x1xi1> to vector<24x129xi1>
      %36 = vector.broadcast %cst_10 : f32 to vector<24x129xf32>
      %37 = arith.select %35, %23, %36 : vector<24x129xi1>, vector<24x129xf32>
      %38 = vector.shape_cast %33 : vector<24x129xf32> to vector<1x3x8x129xf32>
      %cst_11 = arith.constant dense<0.000000e+00> : vector<1x8x129xf32>
      %39 = vector.multi_reduction <add>, %38, %cst_11 [1] : vector<1x3x8x129xf32> to vector<1x8x129xf32>
      %40 = arith.addf %13, %39 : vector<1x8x129xf32>
      %41 = vector.shape_cast %37 : vector<24x129xf32> to vector<1x3x8x129xf32>
      %cst_12 = arith.constant dense<0.000000e+00> : vector<1x8x129xf32>
      %42 = vector.multi_reduction <add>, %41, %cst_12 [1] : vector<1x3x8x129xf32> to vector<1x8x129xf32>
      %43 = arith.addf %14, %42 : vector<1x8x129xf32>
      %c1_i32 = arith.constant 1 : i32
      %c0_13 = arith.constant 0 : index
      %c0_14 = arith.constant 0 : index
      %c0_15 = arith.constant 0 : index
      %44 = vector.load %arg4[%c0_13, %c0_14, %c0_15] : memref<1x8x129xf32, #tpu.memory_space<vmem>>, vector<1x8x129xf32>
      %45 = arith.addf %44, %40 : vector<1x8x129xf32>
      %c0_16 = arith.constant 0 : index
      %c0_17 = arith.constant 0 : index
      %c0_18 = arith.constant 0 : index
      %46 = vector.load %arg4[%c0_16, %c0_17, %c0_18] : memref<1x8x129xf32, #tpu.memory_space<vmem>>, vector<1x8x129xf32>
      tpu.vector_store %arg4[%c0_16, %c0_17, %c0_18], %45 {strides = array<i32>} : memref<1x8x129xf32, #tpu.memory_space<vmem>>, vector<1x8x129xf32>,
      %c0_19 = arith.constant 0 : index
      %c0_20 = arith.constant 0 : index
      %c0_21 = arith.constant 0 : index
      %47 = vector.load %arg5[%c0_19, %c0_20, %c0_21] : memref<1x8x129xf32, #tpu.memory_space<vmem>>, vector<1x8x129xf32>
      %48 = arith.addf %47, %43 : vector<1x8x129xf32>
      %c0_22 = arith.constant 0 : index
      %c0_23 = arith.constant 0 : index
      %c0_24 = arith.constant 0 : index
      %49 = vector.load %arg5[%c0_22, %c0_23, %c0_24] : memref<1x8x129xf32, #tpu.memory_space<vmem>>, vector<1x8x129xf32>
      tpu.vector_store %arg5[%c0_22, %c0_23, %c0_24], %48 {strides = array<i32>} : memref<1x8x129xf32, #tpu.memory_space<vmem>>, vector<1x8x129xf32>,
    } else {
    }
    %true = arith.constant true
    %10 = arith.xori %7, %true : i1
    %11 = arith.extui %10 : i1 to i32
    %c0_i32_3 = arith.constant 0 : i32
    %12 = arith.cmpi ne, %11, %c0_i32_3 : i32
    scf.if %12 {
      %cst = arith.constant 0.000000e+00 : f32
      %13 = vector.broadcast %cst : f32 to vector<1x8x129xf32>
      %cst_4 = arith.constant 0.000000e+00 : f32
      %14 = vector.broadcast %cst_4 : f32 to vector<1x8x129xf32>
      %c0_i32_5 = arith.constant 0 : i32
      %c24_i32_6 = arith.constant 24 : i32
      %15 = arith.muli %c0_i32_5, %c24_i32_6 : i32
      %16 = tpu.assume_multiple %15, 24 : i32
      %17 = arith.index_cast %16 : i32 to index
      %c0 = arith.constant 0 : index
      %18 = vector.load %arg2[%17, %c0] : memref<24x129xf32, #tpu.memory_space<vmem>>, vector<24x129xf32>
      %19 = arith.index_cast %16 : i32 to index
      %c0_7 = arith.constant 0 : index
      %20 = vector.load %arg3[%19, %c0_7] : memref<24x129xf32, #tpu.memory_space<vmem>>, vector<24x129xf32>
      %21 = arith.subf %20, %18 : vector<24x129xf32>
      %22 = arith.mulf %21, %21 : vector<24x129xf32>
      %23 = arith.mulf %20, %20 : vector<24x129xf32>
      %24 = vector.shape_cast %22 : vector<24x129xf32> to vector<1x3x8x129xf32>
      %cst_8 = arith.constant dense<0.000000e+00> : vector<1x8x129xf32>
      %25 = vector.multi_reduction <add>, %24, %cst_8 [1] : vector<1x3x8x129xf32> to vector<1x8x129xf32>
      %26 = arith.addf %13, %25 : vector<1x8x129xf32>
      %27 = vector.shape_cast %23 : vector<24x129xf32> to vector<1x3x8x129xf32>
      %cst_9 = arith.constant dense<0.000000e+00> : vector<1x8x129xf32>
      %28 = vector.multi_reduction <add>, %27, %cst_9 [1] : vector<1x3x8x129xf32> to vector<1x8x129xf32>
      %29 = arith.addf %14, %28 : vector<1x8x129xf32>
      %c1_i32 = arith.constant 1 : i32
      %c0_10 = arith.constant 0 : index
      %c0_11 = arith.constant 0 : index
      %c0_12 = arith.constant 0 : index
      %30 = vector.load %arg4[%c0_10, %c0_11, %c0_12] : memref<1x8x129xf32, #tpu.memory_space<vmem>>, vector<1x8x129xf32>
      %31 = arith.addf %30, %26 : vector<1x8x129xf32>
      %c0_13 = arith.constant 0 : index
      %c0_14 = arith.constant 0 : index
      %c0_15 = arith.constant 0 : index
      %32 = vector.load %arg4[%c0_13, %c0_14, %c0_15] : memref<1x8x129xf32, #tpu.memory_space<vmem>>, vector<1x8x129xf32>
      tpu.vector_store %arg4[%c0_13, %c0_14, %c0_15], %31 {strides = array<i32>} : memref<1x8x129xf32, #tpu.memory_space<vmem>>, vector<1x8x129xf32>,
      %c0_16 = arith.constant 0 : index
      %c0_17 = arith.constant 0 : index
      %c0_18 = arith.constant 0 : index
      %33 = vector.load %arg5[%c0_16, %c0_17, %c0_18] : memref<1x8x129xf32, #tpu.memory_space<vmem>>, vector<1x8x129xf32>
      %34 = arith.addf %33, %29 : vector<1x8x129xf32>
      %c0_19 = arith.constant 0 : index
      %c0_20 = arith.constant 0 : index
      %c0_21 = arith.constant 0 : index
      %35 = vector.load %arg5[%c0_19, %c0_20, %c0_21] : memref<1x8x129xf32, #tpu.memory_space<vmem>>, vector<1x8x129xf32>
      tpu.vector_store %arg5[%c0_19, %c0_20, %c0_21], %34 {strides = array<i32>} : memref<1x8x129xf32, #tpu.memory_space<vmem>>, vector<1x8x129xf32>,
    } else {
    }
    return
  }
  func.func @transform_0(%arg0: i32, %arg1: i32) -> (i32, i32) {
    %c2_i32 = arith.constant 2 : i32
    %0 = arith.muli %arg0, %c2_i32 : i32
    %1 = arith.addi %0, %arg1 : i32
    %c1_i32 = arith.constant 1 : i32
    %2 = arith.minsi %1, %c1_i32 : i32
    %c0_i32 = arith.constant 0 : i32
    %c0_i32_0 = arith.constant 0 : i32
    return %2, %c0_i32 : i32, i32
  }
  func.func @transform_1(%arg0: i32, %arg1: i32) -> (i32, i32) {
    %c2_i32 = arith.constant 2 : i32
    %0 = arith.muli %arg0, %c2_i32 : i32
    %1 = arith.addi %0, %arg1 : i32
    %c1_i32 = arith.constant 1 : i32
    %2 = arith.minsi %1, %c1_i32 : i32
    %c0_i32 = arith.constant 0 : i32
    %c0_i32_0 = arith.constant 0 : i32
    return %2, %c0_i32 : i32, i32
  }
  func.func @transform_2(%arg0: i32, %arg1: i32) -> (i32, i32, i32) {
    %c0_i32 = arith.constant 0 : i32
    %c0_i32_0 = arith.constant 0 : i32
    %c0_i32_1 = arith.constant 0 : i32
    return %arg0, %c0_i32, %c0_i32_0 : i32, i32, i32
  }
  func.func @transform_3(%arg0: i32, %arg1: i32) -> (i32, i32, i32) {
    %c0_i32 = arith.constant 0 : i32
    %c0_i32_0 = arith.constant 0 : i32
    %c0_i32_1 = arith.constant 0 : i32
    return %arg0, %c0_i32, %c0_i32_0 : i32, i32, i32
  }
}

</mosaic_0001>

<bundles_post_ra>
// kernel: tpu_custom_call.1
= control target key start
LH: loop header
LB: loop body
LE: loop exit
PB: predicated region body
PF: predicated region fallthrough
CT: control target
= control target key end

     0   :  { %9 = vsyncpa [#allocation3], 0  ;;  %s1207_s0 = inlined_call_operand.hbm [shape: f32[26,129], index: 0, kind: input, shape index: {}]   ;;  %s1208_s1 = inlined_call_operand.hbm [shape: f32[26,129], index: 1, kind: input, shape index: {}]   ;;  %s1209_s2 = inlined_call_operand.hbm [shape: f32[1,8,129], index: 2, kind: output, shape index: {0}]   ;;  %s1210_s3 = inlined_call_operand.hbm [shape: f32[1,8,129], index: 3, kind: output, shape index: {1}]  }
   0x1   :  { %11 = vsyncpa [#allocation3 + $0x1], 0 }
   0x2   :  { %12 = vsyncpa [#allocation6], 0 }
   0x3   :  { %14 = vsyncpa [#allocation6 + $0x1], 0 }
   0x4   :  { %15 = vsyncpa [#allocation4], 0 }
   0x5   :  { %16 = vsyncpa [#allocation9], 0  ;;  %s946_s12 = smov 0   ;;  %s948_s13 = smov 0  }
   0x6   :  { %s950_s14 = smov 0   ;;  %s952_s15 = smov 0  }
   0x7   :  { %s954_s16 = smov 0   ;;  %s956_s17 = smov 0  }
   0x8 LB: > { %s31_s18 = sadd.s32 1, %s911_s16  ;;  %p40_p1 = scmp.lt.s32.totalorder %s911_s16, 1  ;;  %s915_s17 = sphi %s956_s17, %s22_s17   ;;  %s911_s16 = sphi %s954_s16, %s1220_s16   ;;  %s907_s15 = sphi %s952_s15, %s1219_s15   ;;  %s903_s14 = sphi %s950_s14, %s1218_s14   ;;  %s899_s13 = sphi %s948_s13, %s1217_s13   ;;  %s895_s12 = sphi %s946_s12, %s1216_s12  }
   0x9   : > { %p32_p0 = scmp.ge.s32.totalorder %s31_s18, 2  ;;  %s612_s19 = sadd.s32 4294967295, %s915_s17  }
   0xa   : > { %p56_p2 = scmp.ne.s32.totalorder %s903_s14, %s899_s13  ;;  %p57_p4 = scmp.eq.s32.totalorder %s915_s17, 0 }
   0xb   : > { %s1222_s18 = smov (%p32_p0, %s31_s18), 0  ;;  %p62_p5 = scmp.ne.s32.totalorder %s899_s13, %s895_s12 }
   0xc   : > { %s982_s20 = scalar_select %p40_p1, %s911_s16, 1 }
   0xd   : > { %p44_p3 = scmp.lt.s32.totalorder %s1222_s18, 1  ;;  %p63_p6 = scmp.eq.s32.totalorder %s612_s19, 0 }
   0xe   : > { %p990_p7 = por %p57_p4, %p56_p2  ;;  %s49_s25 = sadd.s32 1, %s903_s14 }
   0xf   : > { %s45_s21 = scalar_select %p44_p3, %s1222_s18, 1 }
  0x10   : > { %p994_p8 = por %p63_p6, %p62_p5  ;;  %p614_p10 = scmp.ge.s32.totalorder %s915_s17, 2 }
  0x11   : > { %s46_s24 = ssub.s32 %s982_s20, %s45_s21 }
  0x12   : > { %p47_p9 = scmp.eq.s32.totalorder %s46_s24, 0  ;;  %168 = sbr.rel (%p614_p10) target bundleno = 99 (0x63), region = 16 }
  0x14   : > { %s1001_s26 = scalar_select %p47_p9, %s903_s14, %s49_s25  }
  0x17   : > { %171 = sbr.rel (!%p990_p7) target bundleno = 61 (0x3d), region = 20  ;;  %s172_s27 = sand.u32 (%p990_p7), 1, %s903_s14  }
  0x18   : > { %s181_s28 = smul.u32 (%p990_p7), 3, %s982_s20  ;;  %s1011_s7 = scalar_lea.sflag (%p990_p7), [#allocation3], %s172_s27 }
  0x19   : > { %s647_s29 = smul.u32 (%p990_p7), 48, %s172_s27 }
  0x1a   : > { %s182_s30 = ssub.s32 (%p990_p7), 4, %s181_s28 }
  0x1b   : > { %p183_p11 = scmp.lt.s32.totalorder (%p990_p7), %s182_s30, 3  ;;  %s176_s8 = scalar_lea.vmem (%p990_p7), [#allocation2], %s647_s29 }
  0x1d   : > { %s1224_s30 = smov (!%p183_p11, %s182_s30), 3 }
  0x1e   : > { %s639_s4 = sshll.u32 %s1224_s30, 4 }
  0x1f   : > { %s187_s5 = ssub.s32 48, %s639_s4 }
  0x20   : > { %s188_s6 = sshll.u32 %s187_s5, 4 }
  0x21   : > { %189 = vsyncadd %s1011_s7, %s188_s6  ;;  %p1014_p12 = scmp.ne.s32.totalorder %s639_s4, 0  ;;  %s645_s10 = smul.u32 48, %s982_s20 }
  0x22   : > { %s1019_s11 = sshll.u32 %s176_s8, 4  ;;  %s621_s12 = sshll.u32 %s1224_s30, 8  ;;  %s198_s11 = int_to_ptr.vmem [resolvable:$true] %s1019_s11 }
  0x23   : > { %s193_s25 = scalar_lea.hbm %s1207_s0, %s645_s10  ;;  %s721_s29 = sshrl.u32 %s621_s12, 4 }
  0x24   : > { %s195_s27 = sshll.u32 %s193_s25, 4  ;;  %s730_s8 = scalar_lea.hbm %s1207_s0, 64  ;;  %s1026_s27 = int_to_ptr.hbm [resolvable:$true] %s195_s27 }
  0x25   : > { %s719_s28 = sshra.s32 %s1026_s27, 4  ;;  %s720_s28 = int_to_ptr.hbm [resolvable:$true] %s719_s28 }
  0x26   : > { %s726_s4 = scalar_lea.hbm %s720_s28, %s721_s29 }
  0x27   : > { %p727_p13 = scmp.ne.s32.totalorder %s720_s28, %s726_s4  ;;  %p732_p2 = scmp.lt.s32.totalorder %s730_s8, %s726_s4 }
  0x29   : > { %p728_p0 = pnand %p727_p13, %p1014_p12 }
  0x2b   : > { %p729_p1 = pneg %p728_p0 }
  0x2d   : > { %p734_p3 = pnand %p732_p2, %p729_p1 }
  0x2f   : > { %737 = shalt.err (!%p734_p3)
}
  0x30   : > { %s738_s10 = sshra.s32 %s198_s11, 4  ;;  %s917_s24 = smov [#allocation2]   ;;  %s739_s10 = int_to_ptr.vmem [resolvable:$true] %s738_s10 }
  0x31   : > { %s745_s21 = scalar_lea.vmem %s739_s10, %s721_s29  ;;  %s749_s25 = scalar_lea.vmem %s917_s24, 96 }
  0x32   : > { %p746_p4 = scmp.ne.s32.totalorder %s739_s10, %s745_s21  ;;  %p751_p9 = scmp.lt.s32.totalorder %s749_s25, %s745_s21 }
  0x34   : > { %p747_p5 = pnand %p746_p4, %p1014_p12 }
  0x36   : > { %p748_p6 = pneg %p747_p5 }
  0x38   : > { %p753_p10 = pnand %p751_p9, %p748_p6 }
  0x3a   : > { %756 = shalt.err (!%p753_p10)
}
  0x3b   : > { %s918_s28 = smov 256   ;;  %s919_s4 = smov 16  }
  0x3c   : > { %203 = dma.hbm_to_vmem [thread:$0]  (%p1014_p12), %s1026_s27, %s621_s12, %s198_s11, %s1011_s7, %s918_s28, %s918_s28, %s919_s4  }
  0x3d PF: > { %206 = sbr.rel (!%p990_p7) target bundleno = 99 (0x63), region = 24  ;;  %s207_s29 = sand.u32 (%p990_p7), 1, %s903_s14  }
  0x3e   : > { %s216_s5 = smul.u32 (%p990_p7), 3, %s982_s20  ;;  %s1055_s24 = scalar_lea.sflag (%p990_p7), [#allocation6], %s207_s29 }
  0x3f   : > { %s648_s6 = smul.u32 (%p990_p7), 48, %s207_s29 }
  0x40   : > { %s217_s8 = ssub.s32 (%p990_p7), 4, %s216_s5 }
  0x41   : > { %p218_p11 = scmp.lt.s32.totalorder (%p990_p7), %s217_s8, 3  ;;  %s211_s30 = scalar_lea.vmem (%p990_p7), [#allocation5], %s648_s6 }
  0x43   : > { %s1226_s8 = smov (!%p218_p11, %s217_s8), 3 }
  0x44   : > { %s642_s10 = sshll.u32 %s1226_s8, 4 }
  0x45   : > { %s222_s21 = ssub.s32 48, %s642_s10 }
  0x46   : > { %s223_s9 = sshll.u32 %s222_s21, 4 }
  0x47   : > { %224 = vsyncadd %s1055_s24, %s223_s9  ;;  %p1058_p7 = scmp.ne.s32.totalorder %s642_s10, 0  ;;  %s646_s7 = smul.u32 48, %s982_s20 }
  0x48   : > { %s1063_s11 = sshll.u32 %s211_s30, 4  ;;  %s628_s12 = sshll.u32 %s1226_s8, 8  ;;  %s233_s11 = int_to_ptr.vmem [resolvable:$true] %s1063_s11 }
  0x49   : > { %s228_s28 = scalar_lea.hbm %s1208_s1, %s646_s7  ;;  %s760_s5 = sshrl.u32 %s628_s12, 4 }
  0x4a   : > { %s230_s4 = sshll.u32 %s228_s28, 4  ;;  %s769_s21 = scalar_lea.hbm %s1208_s1, 64  ;;  %s1070_s4 = int_to_ptr.hbm [resolvable:$true] %s230_s4 }
  0x4b   : > { %s758_s29 = sshra.s32 %s1070_s4, 4  ;;  %s759_s29 = int_to_ptr.hbm [resolvable:$true] %s758_s29 }
  0x4c   : > { %s765_s6 = scalar_lea.hbm %s759_s29, %s760_s5 }
  0x4d   : > { %p766_p12 = scmp.ne.s32.totalorder %s759_s29, %s765_s6  ;;  %p771_p1 = scmp.lt.s32.totalorder %s769_s21, %s765_s6 }
  0x4f   : > { %p767_p13 = pnand %p766_p12, %p1058_p7 }
  0x51   : > { %p768_p0 = pneg %p767_p13 }
  0x53   : > { %p773_p2 = pnand %p771_p1, %p768_p0 }
  0x55   : > { %776 = shalt.err (!%p773_p2)
}
  0x56   : > { %s777_s9 = sshra.s32 %s233_s11, 4  ;;  %s920_s7 = smov [#allocation5]   ;;  %s778_s9 = int_to_ptr.vmem [resolvable:$true] %s777_s9 }
  0x57   : > { %s784_s30 = scalar_lea.vmem %s778_s9, %s760_s5  ;;  %s788_s27 = scalar_lea.vmem %s920_s7, 96 }
  0x58   : > { %p785_p3 = scmp.ne.s32.totalorder %s778_s9, %s784_s30  ;;  %p790_p6 = scmp.lt.s32.totalorder %s788_s27, %s784_s30 }
  0x5a   : > { %p786_p4 = pnand %p785_p3, %p1058_p7 }
  0x5c   : > { %p787_p5 = pneg %p786_p4 }
  0x5e   : > { %p792_p9 = pnand %p790_p6, %p787_p5 }
  0x60   : > { %795 = shalt.err (!%p792_p9)
}
  0x61   : > { %s921_s25 = smov 256   ;;  %s922_s28 = smov 16  }
  0x62   : > { %238 = dma.hbm_to_vmem [thread:$0]  (%p1058_p7), %s1070_s4, %s628_s12, %s233_s11, %s1055_s24, %s921_s25, %s921_s25, %s922_s28  }
  0x63 PF: > { %p629_p10 = scmp.ge.s32.totalorder %s915_s17, 1  ;;  %p240_p11 = scmp.lt.s32.totalorder %s915_s17, 3 }
  0x65   : > { %p241_p12 = pnand %p629_p10, %p240_p11 }
  0x66   : > { %s246_s29 = sand.u32 (!%p241_p12), 1, %s899_s13  }
  0x67   : > { %244 = sbr.rel (%p241_p12) target bundleno = 190 (0xbe), region = 28  ;;  %s247_s6 = scalar_lea.sflag (!%p241_p12), [#allocation3], %s246_s29 }
  0x68   : > { %s649_s5 = smul.u32 (!%p241_p12), 48, %s246_s29 }
  0x6a   : > { %s1095_s20 = scalar_lea.vmem (!%p241_p12), [#allocation2], %s649_s5 }
  0x6c   : > { %878 = dma.done.wait (%p994_p8), %s247_s6, 768  }
  0x6d   : > { %880 = vsyncadd (%p994_p8), %s247_s6, 4294966528  ;;  %s257_s8 = scalar_lea.sflag [#allocation6], %s246_s29  ;;  %s1101_s24 = scalar_lea.vmem [#allocation5], %s649_s5 }
  0x6e   : > { %882 = dma.done.wait (%p994_p8), %s257_s8, 768  }
  0x6f   : > { %884 = vsyncadd (%p994_p8), %s257_s8, 4294966528  ;;  %p630_p7 = scmp.ne.s32.totalorder %s907_s15, 0 }
  0x71   : > { %307 = sbr.rel (%p630_p7) target bundleno = 123 (0x7b), region = 40 }
  0x76   : > { %vm309_vm0 = vcmask 7168   ;;  %v923_v0 = vmov 0.0  }
  0x77   : > { %308 = vst [vmem:[#allocation7] sm:$0xff] %v923_v0 }
  0x78   : > { %311 = vst [vmem:[#allocation8] sm:$0xff] %v923_v0 }
  0x79   : > { %310 = vst.msk [vmem:[#allocation7 + $0x8] sm:$0xff] %vm309_vm0, %v923_v0 }
  0x7a   : > { %312 = vst.msk [vmem:[#allocation8 + $0x8] sm:$0xff] %vm309_vm0, %v923_v0 }
  0x7b PF: > { %s315_s22 = smul.u32 24, %s907_s15 }
  0x7d   : > { %s1109_s11 = sadd.s32 24, %s315_s22 }
  0x7e   : > { %p631_p13 = scmp.le.s32.totalorder %s1109_s11, 26 }
  0x80   : > { %320 = sbr.rel (%p631_p13) target bundleno = 156 (0x9c), region = 44 }
  0x85   : > { %v324_v1 = vld [vmem:[%s1095_s20] sm:$0xff]  ;;  %v326_v2 = vld [vmem:[%s1095_s20 + $0x10] sm:$0xff]  ;;  %v357_v4 = vlaneseq  ;;  %v361_v8 = vstv %s315_s22  ;;  %v325_v13 = vld [vmem:[%s1095_s20 + $0x8] sm:$0xff]  ;;  %vm388_vm1 = vcmask 7168  }
  0x86   : > { %v328_v3 = vld [vmem:[%s1095_s20 + $0x20] sm:$0xff]  ;;  %v334_v6 = vld [vmem:[%s1101_s24 + $0x10] sm:$0xff]  ;;  %v327_v14 = vld [vmem:[%s1095_s20 + $0x18] sm:$0xff] }
  0x87   : > { %v332_v5 = vld [vmem:[%s1101_s24] sm:$0xff]  ;;  %v340_v10 = vsub.f32 %v334_v6, %v326_v2  ;;  %v358_v12 = vshrl.u32 %v357_v4, 7  ;;  %v329_v15 = vld [vmem:[%s1095_s20 + $0x28] sm:$0xff]  ;;  %v335_v17 = vld [vmem:[%s1101_s24 + $0x18] sm:$0xff]  ;;  %v352_v19 = vmul.f32 %v334_v6, %v334_v6 }
  0x88   : > { %v336_v7 = vld [vmem:[%s1101_s24 + $0x20] sm:$0xff]  ;;  %v338_v9 = vsub.f32 %v332_v5, %v324_v1  ;;  %v333_v16 = vld [vmem:[%s1101_s24 + $0x8] sm:$0xff]  ;;  %v350_v18 = vmul.f32 %v332_v5, %v332_v5  ;;  %v341_v29 = vsub.f32 %v335_v17, %v327_v14  ;;  %v353_v33 = vmul.f32 %v335_v17, %v335_v17 }
  0x89   : > { %v342_v11 = vsub.f32 %v336_v7, %v328_v3  ;;  %v354_v20 = vmul.f32 %v336_v7, %v336_v7  ;;  %v346_v22 = vmul.f32 %v340_v10, %v340_v10  ;;  %v359_v24 = vadd.s32 8, %v358_v12  ;;  %v337_v25 = vld [vmem:[%s1101_s24 + $0x28] sm:$0xff]  ;;  %v405_v47 = vld [vmem:[#allocation7] sm:$0xff]  ;;  %v411_v57 = vld [vmem:[#allocation8] sm:$0xff] }
  0x8a   : > { %v344_v21 = vmul.f32 %v338_v9, %v338_v9  ;;  %v360_v26 = vadd.s32 16, %v358_v12  ;;  %v362_v27 = vadd.s32 %v361_v8, %v358_v12  ;;  %v339_v28 = vsub.f32 %v333_v16, %v325_v13  ;;  %v406_v56 = vld [vmem:[#allocation7 + $0x8] sm:$0xff]  ;;  %v412_v6 = vld [vmem:[#allocation8 + $0x8] sm:$0xff] }
  0x8b   : > { %v348_v23 = vmul.f32 %v342_v11, %v342_v11  ;;  %v363_v30 = vadd.s32 %v361_v8, %v359_v24  ;;  %v343_v31 = vsub.f32 %v337_v25, %v329_v15  ;;  %v351_v32 = vmul.f32 %v333_v16, %v333_v16 }
  0x8c   : > { %v364_v34 = vadd.s32 %v361_v8, %v360_v26  ;;  %vm365_vm2 = vcmp.lt.s32.totalorder %v362_v27, 26  ;;  %v345_v35 = vmul.f32 %v339_v28, %v339_v28  ;;  %v347_v36 = vmul.f32 %v341_v29, %v341_v29 }
  0x8d   : > { %vm366_vm3 = vcmp.lt.s32.totalorder %v363_v30, 26  ;;  %v374_v37 = vsel %vm365_vm2, %v344_v21, 0.0  ;;  %v349_v38 = vmul.f32 %v343_v31, %v343_v31  ;;  %v380_v39 = vsel %vm365_vm2, %v350_v18, 0.0 }
  0x8e   : > { %vm367_vm4 = vcmp.lt.s32.totalorder %v364_v34, 26  ;;  %v376_v40 = vsel %vm366_vm3, %v346_v22, 0.0  ;;  %v375_v41 = vsel %vm365_vm2, %v345_v35, 0.0  ;;  %v377_v42 = vsel %vm366_vm3, %v347_v36, 0.0 }
  0x8f   : > { %v378_v43 = vsel %vm367_vm4, %v348_v23, 0.0  ;;  %v386_v44 = vadd.f32 %v376_v40, %v374_v37  ;;  %v379_v45 = vsel %vm367_vm4, %v349_v38, 0.0  ;;  %v389_v46 = vsel %vm388_vm1, %v375_v41, 0.0 }
  0x90   : > { %v390_v48 = vsel %vm388_vm1, %v377_v42, 0.0  ;;  %v392_v49 = vsel %vm388_vm1, %v379_v45, 0.0  ;;  %v382_v50 = vsel %vm366_vm3, %v352_v19, 0.0  ;;  %v384_v51 = vsel %vm367_vm4, %v354_v20, 0.0 }
  0x91   : > { %v387_v52 = vadd.f32 %v386_v44, %v378_v43  ;;  %v391_v53 = vadd.f32 %v390_v48, %v389_v46  ;;  %v396_v54 = vadd.f32 %v382_v50, %v380_v39  ;;  %v355_v55 = vmul.f32 %v337_v25, %v337_v25 }
  0x92   : > { %v381_v58 = vsel %vm365_vm2, %v351_v32, 0.0  ;;  %v383_v59 = vsel %vm366_vm3, %v353_v33, 0.0 }
  0x93   : > { %v407_v60 = vadd.f32 %v405_v47, %v387_v52  ;;  %v393_v61 = vadd.f32 %v392_v49, %v391_v53  ;;  %v397_v62 = vadd.f32 %v396_v54, %v384_v51  ;;  %v385_v63 = vsel %vm367_vm4, %v355_v55, 0.0 }
  0x94   : > { %v398_v0 = vsel %vm388_vm1, %v381_v58, 0.0  ;;  %v399_v1 = vsel %vm388_vm1, %v383_v59, 0.0  ;;  %v401_v2 = vsel %vm388_vm1, %v385_v63, 0.0 }
  0x95   : > { %409 = vst [vmem:[#allocation7] sm:$0xff] %v407_v60  ;;  %v408_v3 = vadd.f32 %v406_v56, %v393_v61  ;;  %v413_v4 = vadd.f32 %v411_v57, %v397_v62  ;;  %v400_v5 = vadd.f32 %v399_v1, %v398_v0 }
  0x97   : > { %410 = vst.msk [vmem:[#allocation7 + $0x8] sm:$0xff] %vm388_vm1, %v408_v3  ;;  %v402_v7 = vadd.f32 %v401_v2, %v400_v5 }
  0x98   : > { %415 = vst [vmem:[#allocation8] sm:$0xff] %v413_v4 }
  0x99   : > { %v414_v8 = vadd.f32 %v412_v6, %v402_v7 }
  0x9b   : > { %416 = vst.msk [vmem:[#allocation8 + $0x8] sm:$0xff] %vm388_vm1, %v414_v8 }
  0x9c PF: > { %p632_p8 = scmp.gt.s32.totalorder %s1109_s11, 26 }
  0x9e   : > { %420 = sbr.rel (%p632_p8) target bundleno = 180 (0xb4), region = 48 }
  0xa3   : > { %v424_v9 = vld [vmem:[%s1095_s20] sm:$0xff]  ;;  %v426_v10 = vld [vmem:[%s1095_s20 + $0x10] sm:$0xff]  ;;  %v425_v18 = vld [vmem:[%s1095_s20 + $0x8] sm:$0xff]  ;;  %vm458_vm5 = vcmask 7168  }
  0xa4   : > { %v428_v11 = vld [vmem:[%s1095_s20 + $0x20] sm:$0xff]  ;;  %v434_v13 = vld [vmem:[%s1101_s24 + $0x10] sm:$0xff]  ;;  %v427_v19 = vld [vmem:[%s1095_s20 + $0x18] sm:$0xff] }
  0xa5   : > { %v432_v12 = vld [vmem:[%s1101_s24] sm:$0xff]  ;;  %v440_v16 = vsub.f32 %v434_v13, %v426_v10  ;;  %v429_v21 = vld [vmem:[%s1095_s20 + $0x28] sm:$0xff]  ;;  %v435_v23 = vld [vmem:[%s1101_s24 + $0x18] sm:$0xff]  ;;  %v452_v24 = vmul.f32 %v434_v13, %v434_v13 }
  0xa6   : > { %v436_v14 = vld [vmem:[%s1101_s24 + $0x20] sm:$0xff]  ;;  %v438_v15 = vsub.f32 %v432_v12, %v424_v9  ;;  %v450_v20 = vmul.f32 %v432_v12, %v432_v12  ;;  %v433_v22 = vld [vmem:[%s1101_s24 + $0x8] sm:$0xff]  ;;  %v441_v31 = vsub.f32 %v435_v23, %v427_v19  ;;  %v453_v38 = vmul.f32 %v435_v23, %v435_v23 }
  0xa7   : > { %v442_v17 = vsub.f32 %v436_v14, %v428_v11  ;;  %v454_v25 = vmul.f32 %v436_v14, %v436_v14  ;;  %v446_v27 = vmul.f32 %v440_v16, %v440_v16  ;;  %v437_v29 = vld [vmem:[%s1101_s24 + $0x28] sm:$0xff]  ;;  %v439_v30 = vsub.f32 %v433_v22, %v425_v18  ;;  %v481_v37 = vld [vmem:[#allocation8] sm:$0xff]  ;;  %v475_v40 = vld [vmem:[#allocation7] sm:$0xff] }
  0xa8   : > { %v444_v26 = vmul.f32 %v438_v15, %v438_v15  ;;  %v443_v32 = vsub.f32 %v437_v29, %v429_v21  ;;  %v466_v33 = vadd.f32 %v452_v24, %v450_v20  ;;  %v451_v34 = vmul.f32 %v433_v22, %v433_v22  ;;  %v482_v55 = vld [vmem:[#allocation8 + $0x8] sm:$0xff]  ;;  %v476_v56 = vld [vmem:[#allocation7 + $0x8] sm:$0xff] }
  0xa9   : > { %v448_v28 = vmul.f32 %v442_v17, %v442_v17  ;;  %v445_v36 = vmul.f32 %v439_v30, %v439_v30  ;;  %v455_v39 = vmul.f32 %v437_v29, %v437_v29  ;;  %v447_v41 = vmul.f32 %v441_v31, %v441_v31 }
  0xaa   : > { %v456_v35 = vadd.f32 %v446_v27, %v444_v26  ;;  %v449_v42 = vmul.f32 %v443_v32, %v443_v32  ;;  %v467_v43 = vadd.f32 %v466_v33, %v454_v25  ;;  %v468_v44 = vsel %vm458_vm5, %v451_v34, 0.0 }
  0xab   : > { %v459_v46 = vsel %vm458_vm5, %v445_v36, 0.0  ;;  %v469_v47 = vsel %vm458_vm5, %v453_v38, 0.0  ;;  %v471_v48 = vsel %vm458_vm5, %v455_v39, 0.0  ;;  %v460_v49 = vsel %vm458_vm5, %v447_v41, 0.0 }
  0xac   : > { %v457_v45 = vadd.f32 %v456_v35, %v448_v28  ;;  %v462_v50 = vsel %vm458_vm5, %v449_v42, 0.0  ;;  %v483_v51 = vadd.f32 %v481_v37, %v467_v43  ;;  %v470_v52 = vadd.f32 %v469_v47, %v468_v44 }
  0xad   : > { %v461_v54 = vadd.f32 %v460_v49, %v459_v46 }
  0xae   : > { %v477_v53 = vadd.f32 %v475_v40, %v457_v45  ;;  %485 = vst [vmem:[#allocation8] sm:$0xff] %v483_v51  ;;  %v472_v57 = vadd.f32 %v471_v48, %v470_v52 }
  0xaf   : > { %v463_v58 = vadd.f32 %v462_v50, %v461_v54 }
  0xb0   : > { %479 = vst [vmem:[#allocation7] sm:$0xff] %v477_v53  ;;  %v484_v59 = vadd.f32 %v482_v55, %v472_v57 }
  0xb1   : > { %v478_v60 = vadd.f32 %v476_v56, %v463_v58 }
  0xb2   : > { %486 = vst.msk [vmem:[#allocation8 + $0x8] sm:$0xff] %vm458_vm5, %v484_v59 }
  0xb3   : > { %480 = vst.msk [vmem:[#allocation7 + $0x8] sm:$0xff] %vm458_vm5, %v478_v60 }
  0xb4 PF: > { %p1167_p0 = scmp.eq.s32.totalorder %s612_s19, 1  ;;  %s498_s4 = sshll.u32 %s1209_s2, 4  ;;  %s499_s4 = int_to_ptr.hbm [resolvable:$true] %s498_s4 }
  0xb5   : > { %s924_s10 = smov [#allocation7]   ;;  %s925_s9 = smov [#allocation8]  }
  0xb6   : > { %s496_s21 = sshll.u32 %s924_s10, 4  ;;  %s511_s30 = sshll.u32 %s925_s9, 4  ;;  %s497_s21 = int_to_ptr.vmem [resolvable:$true] %s496_s21  ;;  %s512_s30 = int_to_ptr.vmem [resolvable:$true] %s511_s30 }
  0xb7   : > { %653 = dma.vmem_to_hbm [thread:$0]  (%p1167_p0), %s497_s21, 256, %s499_s4, [#allocation4]  }
  0xb8   : > { %s513_s27 = sshll.u32 %s1210_s3, 4  ;;  %s514_s27 = int_to_ptr.hbm [resolvable:$true] %s513_s27 }
  0xb9   : > { %655 = dma.vmem_to_hbm [thread:$0]  (%p1167_p0), %s512_s30, 256, %s514_s27, [#allocation9]  }
  0xba   : > { %886 = dma.done.wait (%p1167_p0), [#allocation4], 256  }
  0xbb   : > { %888 = vsyncadd (%p1167_p0), [#allocation4], 4294967040 }
  0xbc   : > { %890 = dma.done.wait (%p1167_p0), [#allocation9], 256  }
  0xbd   : > { %892 = vsyncadd (%p1167_p0), [#allocation9], 4294967040 }
  0xbe PF: > { %s22_s17 = sadd.s32 1, %s915_s17   ;;  %s1216_s12 = smov %s899_s13 }
  0xbf   : > { %p19_p1 = scmp.ge.s32.totalorder %s22_s17, 4   ;;  %s1217_s13 = smov %s903_s14 }
  0xc0   : > { %s1218_s14 = smov %s1001_s26  ;;  %s1219_s15 = smov %s911_s16 }
  0xc1   : > { %s1220_s16 = smov %s1222_s18  ;;  %21 = sbr.rel (!%p19_p1) target bundleno = 8 (0x8), region = 104 }
  0xc6   :  { %532 = vsyncpa [#allocation3], 1 }
  0xc7   :  { %534 = vsyncpa [#allocation3 + $0x1], 1 }
  0xc8   :  { %535 = vsyncpa [#allocation6], 1 }
  0xc9   :  { %537 = vsyncpa [#allocation6 + $0x1], 1 }
  0xca   :  { %538 = vsyncpa [#allocation4], 1 }
  0xcb   :  { %540 = vsyncpa [#allocation4 + $0x1], 1 }
  0xcc   :  { %541 = vsyncpa [#allocation9], 1 }

</bundles_post_ra>
